<compile_context>
chip_gen: v6e
topology: v6e:2x2x1
jax: 0.10.0
libtpu: 0.0.40
codegen_flags: <defaults>
</compile_context>

<pallas_src>
import jax
import jax.numpy as jnp
from jax.experimental import pallas as pl
from jax.experimental.pallas import tpu as pltpu

P_DROP = 0.6
KEEP_PROB = 1.0 - P_DROP
TILE_B = 8  # batch rows per grid step (multiple of 8 sublanes)


def policy_kernel(x_ref, w1t_ref, w2t_ref, u_ref, out_ref):
    # ---- Linear 1 (no bias): [TB, S] @ [S, H] -> [TB, H], bf16 MXU, f32 acc
    x_bf16 = x_ref[...].astype(jnp.bfloat16)
    h = jnp.dot(x_bf16, w1t_ref[...], preferred_element_type=jnp.float32)

    # ---- Dropout(p=0.6, inverted scaling) fused with ReLU (single select)
    keep = u_ref[...] < KEEP_PROB
    h = jnp.where(keep & (h > 0.0), h * (1.0 / KEEP_PROB), 0.0)

    # ---- Linear 2 (no bias): [TB, H] @ [H, A] -> [TB, A]
    logits = jnp.dot(h.astype(jnp.bfloat16), w2t_ref[...],
                     preferred_element_type=jnp.float32)

    # ---- Numerically-stable softmax over the last dim (f32)
    m = jnp.max(logits, axis=-1, keepdims=True)
    e = jnp.exp(logits - m)
    out_ref[...] = e / jnp.sum(e, axis=-1, keepdims=True)


@jax.jit
def policy_forward(x, w1t, w2t, u):
    """x: [B, S] f32; w1t: [S, H] bf16; w2t: [H, A] bf16; u: [B, H] f32 in [0,1)."""
    B, S = x.shape
    H = w1t.shape[1]
    A = w2t.shape[1]
    assert B % TILE_B == 0, "demo assumes batch divisible by TILE_B"
    grid = (B // TILE_B,)

    return pl.pallas_call(
        policy_kernel,
        out_shape=jax.ShapeDtypeStruct((B, A), jnp.float32),
        grid=grid,
        in_specs=[
            pl.BlockSpec((TILE_B, S), lambda i: (i, 0)),   # x tile (pipelined)
            pl.BlockSpec((S, H), lambda i: (0, 0)),        # w1t: VMEM-resident
            pl.BlockSpec((H, A), lambda i: (0, 0)),        # w2t: VMEM-resident
            pl.BlockSpec((TILE_B, H), lambda i: (i, 0)),   # dropout randoms tile
        ],
        out_specs=pl.BlockSpec((TILE_B, A), lambda i: (i, 0)),
        compiler_params=pltpu.CompilerParams(
            dimension_semantics=("parallel",)),
    )(x, w1t, w2t, u)


if __name__ == "__main__":
    # Small shapes consistent with the module: state_space=S, hidden=128,
    # action_space=A (Pong has 6 actions).
    B, S, H, A = 32, 64, 128, 6

    key = jax.random.PRNGKey(0)
    kx, k1, k2, kd = jax.random.split(key, 4)

    x = jax.random.normal(kx, (B, S), dtype=jnp.float32)

    # Parameters created ONCE in pre-transposed [in, out] layout, bf16 storage
    # (Kaiming-uniform-like bounds matching nn.Linear shapes).
    bound1 = 1.0 / (S ** 0.5)
    bound2 = 1.0 / (H ** 0.5)
    w1t = jax.random.uniform(k1, (S, H), minval=-bound1, maxval=bound1,
                             dtype=jnp.float32).astype(jnp.bfloat16)  # l1.weight.T
    w2t = jax.random.uniform(k2, (H, A), minval=-bound2, maxval=bound2,
                             dtype=jnp.float32).astype(jnp.bfloat16)  # l2.weight.T

    # Per-call dropout randoms (caller supplies a fresh key per training step).
    u = jax.random.uniform(kd, (B, H), dtype=jnp.float32)

    probs = policy_forward(x, w1t, w2t, u)
    probs = jax.block_until_ready(probs)

    # Sanity: rows are valid probability distributions.
    row_sums = jnp.sum(probs, axis=-1)
    assert probs.shape == (B, A)
    assert bool(jnp.all(jnp.isfinite(probs)))
    assert bool(jnp.allclose(row_sums, 1.0, atol=1e-5))

    print("KERNEL_OK")
</pallas_src>

<mosaic_0001>
module attributes {stable_mosaic.version = 11 : i64} {
  func.func @policy_kernel(%arg0: i32, %arg1: memref<8x64xf32, #tpu.memory_space<vmem>>, %arg2: memref<64x128xbf16, #tpu.memory_space<vmem>>, %arg3: memref<128x6xbf16, #tpu.memory_space<vmem>>, %arg4: memref<8x128xf32, #tpu.memory_space<vmem>>, %arg5: memref<8x6xf32, #tpu.memory_space<vmem>>) attributes {dimension_semantics = [#tpu.dimension_semantics<parallel>], iteration_bounds = array<i64: 4>, scalar_prefetch = 0 : i64, scratch_operands = 0 : i64, tpu.core_type = #tpu.core_type<tc>, window_params = [{transform_indices = @transform_0, window_bounds = array<i64: 8, 64>}, {pipeline_mode = #tpu.pipeline_mode<synchronous>, transform_indices = @transform_1, window_bounds = array<i64: 64, 128>}, {pipeline_mode = #tpu.pipeline_mode<synchronous>, transform_indices = @transform_2, window_bounds = array<i64: 128, 6>}, {transform_indices = @transform_3, window_bounds = array<i64: 8, 128>}, {transform_indices = @transform_4, window_bounds = array<i64: 8, 6>}]} {
    %c0 = arith.constant 0 : index
    %c0_0 = arith.constant 0 : index
    %0 = vector.load %arg1[%c0, %c0_0] : memref<8x64xf32, #tpu.memory_space<vmem>>, vector<8x64xf32>
    %1 = arith.truncf %0 : vector<8x64xf32> to vector<8x64xbf16>
    %c0_1 = arith.constant 0 : index
    %c0_2 = arith.constant 0 : index
    %2 = vector.load %arg2[%c0_1, %c0_2] : memref<64x128xbf16, #tpu.memory_space<vmem>>, vector<64x128xbf16>
    %cst = arith.constant dense<0.000000e+00> : vector<8x128xf32>
    %3 = tpu.matmul %1, %2, %cst {dimension_numbers = #tpu.dot_dimension_numbers<[1], [0], [0], [1], [0, 0, 1, 1], [], []>} : vector<8x64xbf16>, vector<64x128xbf16>, vector<8x128xf32> -> vector<8x128xf32>
    %c0_3 = arith.constant 0 : index
    %c0_4 = arith.constant 0 : index
    %4 = vector.load %arg4[%c0_3, %c0_4] : memref<8x128xf32, #tpu.memory_space<vmem>>, vector<8x128xf32>
    %cst_5 = arith.constant 4.000000e-01 : f32
    %5 = vector.broadcast %cst_5 : f32 to vector<8x128xf32>
    %6 = arith.cmpf olt, %4, %5 : vector<8x128xf32>
    %cst_6 = arith.constant 0.000000e+00 : f32
    %7 = vector.broadcast %cst_6 : f32 to vector<8x128xf32>
    %8 = arith.cmpf ogt, %3, %7 : vector<8x128xf32>
    %9 = arith.andi %6, %8 : vector<8x128xi1>
    %cst_7 = arith.constant 2.500000e+00 : f32
    %10 = vector.broadcast %cst_7 : f32 to vector<8x128xf32>
    %11 = arith.mulf %3, %10 : vector<8x128xf32>
    %cst_8 = arith.constant 0.000000e+00 : f32
    %12 = vector.broadcast %cst_8 : f32 to vector<8x128xf32>
    %13 = arith.select %9, %11, %12 : vector<8x128xi1>, vector<8x128xf32>
    %14 = arith.truncf %13 : vector<8x128xf32> to vector<8x128xbf16>
    %c0_9 = arith.constant 0 : index
    %c0_10 = arith.constant 0 : index
    %15 = vector.load %arg3[%c0_9, %c0_10] : memref<128x6xbf16, #tpu.memory_space<vmem>>, vector<128x6xbf16>
    %cst_11 = arith.constant dense<0.000000e+00> : vector<8x6xf32>
    %16 = tpu.matmul %14, %15, %cst_11 {dimension_numbers = #tpu.dot_dimension_numbers<[1], [0], [0], [1], [0, 0, 1, 1], [], []>} : vector<8x128xbf16>, vector<128x6xbf16>, vector<8x6xf32> -> vector<8x6xf32>
    %cst_12 = arith.constant dense<0xFF800000> : vector<8xf32>
    %17 = vector.multi_reduction <maximumf>, %16, %cst_12 [1] : vector<8x6xf32> to vector<8xf32>
    %18 = vector.shape_cast %17 : vector<8xf32> to vector<8x1xf32>
    %19 = vector.broadcast %18 : vector<8x1xf32> to vector<8x6xf32>
    %20 = arith.subf %16, %19 : vector<8x6xf32>
    %21 = math.exp %20 : vector<8x6xf32>
    %cst_13 = arith.constant dense<0.000000e+00> : vector<8xf32>
    %22 = vector.multi_reduction <add>, %21, %cst_13 [1] : vector<8x6xf32> to vector<8xf32>
    %23 = vector.shape_cast %22 : vector<8xf32> to vector<8x1xf32>
    %24 = vector.broadcast %23 : vector<8x1xf32> to vector<8x6xf32>
    %25 = arith.divf %21, %24 : vector<8x6xf32>
    %c0_14 = arith.constant 0 : index
    %c0_15 = arith.constant 0 : index
    %26 = vector.load %arg5[%c0_14, %c0_15] : memref<8x6xf32, #tpu.memory_space<vmem>>, vector<8x6xf32>
    tpu.vector_store %arg5[%c0_14, %c0_15], %25 {strides = array<i32>} : memref<8x6xf32, #tpu.memory_space<vmem>>, vector<8x6xf32>,
    return
  }
  func.func @transform_0(%arg0: i32) -> (i32, i32) {
    %c0_i32 = arith.constant 0 : i32
    %c0_i32_0 = arith.constant 0 : i32
    return %arg0, %c0_i32 : i32, i32
  }
  func.func @transform_1(%arg0: i32) -> (i32, i32) {
    %c0_i32 = arith.constant 0 : i32
    %c0_i32_0 = arith.constant 0 : i32
    %c0_i32_1 = arith.constant 0 : i32
    return %c0_i32, %c0_i32_0 : i32, i32
  }
  func.func @transform_2(%arg0: i32) -> (i32, i32) {
    %c0_i32 = arith.constant 0 : i32
    %c0_i32_0 = arith.constant 0 : i32
    %c0_i32_1 = arith.constant 0 : i32
    return %c0_i32, %c0_i32_0 : i32, i32
  }
  func.func @transform_3(%arg0: i32) -> (i32, i32) {
    %c0_i32 = arith.constant 0 : i32
    %c0_i32_0 = arith.constant 0 : i32
    return %arg0, %c0_i32 : i32, i32
  }
  func.func @transform_4(%arg0: i32) -> (i32, i32) {
    %c0_i32 = arith.constant 0 : i32
    %c0_i32_0 = arith.constant 0 : i32
    return %arg0, %c0_i32 : i32, i32
  }
}

</mosaic_0001>

<bundles_post_ra>
// kernel: policy_forward.1
= control target key start
LH: loop header
LB: loop body
LE: loop exit
PB: predicated region body
PF: predicated region fallthrough
CT: control target
= control target key end

     0   :  { %9 = vsyncpa [#allocation3], 0  ;;  %s886_s0 = inlined_call_operand.vmem [shape: f32[32,64], index: 0, kind: input, shape index: {}]   ;;  %s887_s1 = inlined_call_operand.vmem [shape: bf16[64,128], index: 1, kind: input, shape index: {}]   ;;  %s888_s2 = inlined_call_operand.vmem [shape: bf16[128,6], index: 2, kind: input, shape index: {}]   ;;  %s889_s3 = inlined_call_operand.hbm [shape: f32[32,128], index: 3, kind: input, shape index: {}]   ;;  %s890_s4 = inlined_call_operand.vmem [shape: f32[32,6], index: 4, kind: output, shape index: {}]  }
   0x1   :  { %11 = vsyncpa [#allocation3 + $0x1], 0  ;;  %s732_s15 = smov 0   ;;  %s734_s16 = smov 0  }
   0x2   :  { %s736_s17 = smov 0   ;;  %s738_s18 = smov 0  }
   0x3 LB: > { %s751_s19 = sadd.s32 4294967295, %s702_s18   ;;  %s754_s20 = sadd.s32 1, %s702_s18   ;;  %s702_s18 = sphi %s738_s18, %s900_s18   ;;  %s698_s17 = sphi %s736_s17, %s899_s17   ;;  %s694_s16 = sphi %s734_s16, %s898_s16   ;;  %s690_s15 = sphi %s732_s15, %s897_s15  }
   0x4   : > { %s89_s21 = ssub.s32 %s702_s18, %s754_s20  ;;  %s92_s22 = sadd.s32 1, %s698_s17 }
   0x5   : > { %p90_p0 = scmp.eq.s32.totalorder %s89_s21, 0  ;;  %p99_p1 = scmp.ne.s32.totalorder %s698_s17, %s694_s16 }
   0x6   : > { %p100_p2 = scmp.eq.s32.totalorder %s702_s18, 0  ;;  %p105_p3 = scmp.ne.s32.totalorder %s694_s16, %s690_s15 }
   0x7   : > { %s764_s23 = scalar_select %p90_p0, %s698_s17, %s92_s22  }
   0x8   : > { %p101_p4 = por %p100_p2, %p99_p1  ;;  %p106_p5 = scmp.eq.s32.totalorder %s751_s19, 0 }
   0x9   : > { %p589_p6 = scmp.lt.s32.totalorder %s702_s18, 4  ;;  %s168_s25 = sand.u32 1, %s698_s17  }
   0xa   : > { %p768_p7 = por %p106_p5, %p105_p3  ;;  %s513_s26 = sshll.u32 %s168_s25, 3 }
   0xb   : > { %s514_s27 = sshll.u32 %s702_s18, 7  ;;  %s172_s5 = scalar_lea.vmem [#allocation2], %s513_s26 }
   0xc   : > { %s892_s24 = scalar_select %p768_p7, 1, 0 }
   0xd   : > { %s777_s30 = scalar_lea.hbm %s889_s3, %s514_s27  ;;  %s179_s6 = sshll.u32 %s172_s5, 4  ;;  %s779_s6 = int_to_ptr.vmem [resolvable:$true] %s179_s6 }
   0xe   : > { %p781_p8 = pnand %p589_p6, %p101_p4  ;;  %s169_s8 = scalar_lea.sflag [#allocation3], %s168_s25 }
   0xf   : > { %s640_s9 = scalar_lea.hbm %s777_s30, 128  ;;  %s645_s12 = scalar_lea.hbm %s889_s3, 512 }
  0x10   : > { %p641_p11 = scmp.ne.s32.totalorder %s777_s30, %s640_s9  ;;  %p642_p12 = pneg %p781_p8 }
  0x11   : > { %p646_p1 = scmp.lt.s32.totalorder %s777_s30, %s889_s3  ;;  %p647_p2 = scmp.lt.s32.totalorder %s645_s12, %s640_s9 }
  0x12   : > { %p643_p13 = pnand %p642_p12, %p641_p11 }
  0x13   : > { %p648_p3 = por %p647_p2, %p646_p1 }
  0x14   : > { %p644_p0 = pneg %p643_p13 }
  0x16   : > { %p649_p4 = pnand %p648_p3, %p644_p0 }
  0x18   : > { %652 = shalt.err (!%p649_p4)
}
  0x19   : > { %s653_s15 = scalar_lea.vmem %s779_s6, 128  ;;  %s704_s21 = smov [#allocation2]  }
  0x1a   : > { %p654_p5 = scmp.ne.s32.totalorder %s779_s6, %s653_s15  ;;  %s658_s22 = sshll.u32 %s704_s21, 4  ;;  %s659_s22 = int_to_ptr.vmem [resolvable:$false] %s658_s22 }
  0x1b   : > { %s660_s25 = scalar_lea.vmem %s659_s22, 256  ;;  %p661_p13 = scmp.lt.s32.totalorder %s779_s6, %s659_s22 }
  0x1c   : > { %p656_p6 = pnand %p654_p5, %p642_p12  ;;  %p662_p9 = scmp.lt.s32.totalorder %s660_s25, %s653_s15 }
  0x1e   : > { %p657_p11 = pneg %p656_p6  ;;  %p663_p10 = por %p662_p9, %p661_p13 }
  0x20   : > { %p664_p7 = pnand %p663_p10, %p657_p11 }
  0x22   : > { %667 = shalt.err (!%p664_p7)
}
  0x23   : > { %588 = dma.hbm_to_vmem [thread:$0]  (!%p781_p8), %s777_s30, 128, %s779_s6, %s169_s8  }
  0x24   : > { %p894_p0 = scmp.lt.s32.totalorder %s702_s18, 5  ;;  %p895_p1 = scmp.ge.s32.totalorder %s702_s18, 1 }
  0x26   : > { %p185_p12 = pnand %p895_p1, %p894_p0 }
  0x27   : > { %s190_s26 = sand.u32 (!%p185_p12), 1, %s694_s16   ;;  %p896_p7 = scmp.ne.s32.totalorder (!%p185_p12), %s892_s24, 0 }
  0x28   : > { %188 = sbr.rel (%p185_p12) target bundleno = 767 (0x2ff), region = 36  ;;  %s810_s27 = sshll.u32 (!%p185_p12), %s190_s26, 3 }
  0x29   : > { %s191_s28 = scalar_lea.sflag (!%p185_p12), [#allocation3], %s190_s26  ;;  %s194_s29 = scalar_lea.vmem (!%p185_p12), [#allocation2], %s810_s27 }
  0x2d   : > { %685 = dma.done.wait (%p896_p7), %s191_s28, 128  }
  0x2e   : > { %687 = vsyncadd (%p896_p7), %s191_s28, 4294967168  ;;  %v705_v0 = vmov 0.0   ;;  %vm706_vm0 = vmmov 0   ;;  %p222_p8 = scmp.lt.s32.totalorder %s751_s19, 3  ;;  %v624_v1 = vld [vmem:[%s887_s1 + $0x18] sm:$0xff]   ;;  %v625_v2 = vld [vmem:[%s887_s1 + $0x10] sm:$0xff]  }
  0x2f   : > { %551 = vmatprep.subr.bf16.mxu0 %v705_v0  ;;  %559 = vmatprep.mubr.msk.bf16.mxu0 %vm706_vm0, %v705_v0  ;;  %v628_v3 = vld [vmem:[%s888_s2 + $0x38] sm:$0xff]   ;;  %v626_v4 = vld [vmem:[%s887_s1 + $0x8] sm:$0xff]   ;;  %v629_v5 = vld [vmem:[%s888_s2 + $0x30] sm:$0xff]   ;;  %vm265_vm1 = vcmask 523264   ;;  %vm420_vm6 = vcmask 48128  }
  0x30   : > { %563 = vmatprep.subr.bf16.mxu1 %v705_v0  ;;  %579 = vmatprep.mubr.msk.bf16.mxu1 %vm706_vm0, %v705_v0  ;;  %s902_s19 = smov (!%p222_p8, %s751_s19), 3  ;;  %v627_v6 = vld [vmem:[%s887_s1] sm:$0xff]   ;;  %v630_v8 = vld [vmem:[%s888_s2 + $0x28] sm:$0xff]   ;;  %v632_v11 = vld [vmem:[%s888_s2 + $0x18] sm:$0xff]  }
  0x31   : > { %552 = vmatpush3.bf16.msra.mxu0 %v624_v1  ;;  %s517_s6 = sshll.u32 %s902_s19, 3  ;;  %564 = vmatpush3.bf16.msra.mxu1 %v628_v3  ;;  %v631_v10 = vld [vmem:[%s888_s2 + $0x20] sm:$0xff]   ;;  %v633_v12 = vld [vmem:[%s888_s2 + $0x10] sm:$0xff]   ;;  %v634_v13 = vld [vmem:[%s888_s2 + $0x8] sm:$0xff]  }
  0x32   : > { %553 = vmatprep.subr.bf16.mxu0 %v705_v0  ;;  %s225_s13 = scalar_lea.vmem %s886_s0, %s517_s6  ;;  %565 = vmatprep.subr.bf16.mxu1 %v705_v0  ;;  %v635_v14 = vld [vmem:[%s888_s2] sm:$0xff]   ;;  %s229_s12 = scalar_lea.vmem %s890_s4, %s517_s6 }
  0x33   : > { %v231_v7 = vld [vmem:[%s225_s13] sm:$0xff] }
  0x34   : > { %v232_v9 = vpack.c.bf16 %v231_v7, %v231_v7  ;;  %v309_v15 = vld [vmem:[%s194_s29] sm:$0xff] }
  0x35   : > { %554 = vmatpush3.bf16.msra.mxu0 %v625_v2  ;;  %566 = vmatpush3.bf16.msra.mxu1 %v629_v5  ;;  %vm310_vm2 = vcmp.lt.f32.partialorder %v309_v15, 0.4 }
  0x36   : > { %555 = vmatprep.subr.bf16.mxu0 %v705_v0  ;;  %567 = vmatprep.subr.bf16.mxu1 %v705_v0 }
  0x39   : > { %556 = vmatpush3.bf16.msra.mxu0 %v626_v4  ;;  %568 = vmatpush3.bf16.msra.mxu1 %v630_v8 }
  0x3a   : > { %557 = vmatprep.subr.bf16.mxu0 %v705_v0  ;;  %569 = vmatprep.subr.bf16.mxu1 %v705_v0 }
  0x3d   : > { %558 = vmatpush3.bf16.msra.mxu0 %v627_v6  ;;  %570 = vmatpush3.bf16.msra.mxu1 %v631_v10 }
  0x3e   : > { %571 = vmatprep.subr.bf16.mxu1 %v705_v0 }
  0x40   : > { %560 = vmatmul.mubr.msk.bf16.vlgmr.msra.gmra.mxu0 %vm265_vm1, %v232_v9 }
  0x41   : > { %572 = vmatpush3.bf16.msra.mxu1 %v632_v11 }
  0x42   : > { %573 = vmatprep.subr.bf16.mxu1 %v705_v0 }
  0x45   : > { %574 = vmatpush3.bf16.msra.mxu1 %v633_v12 }
  0x46   : > { %575 = vmatprep.subr.bf16.mxu1 %v705_v0 }
  0x49   : > { %576 = vmatpush3.bf16.msra.mxu1 %v634_v13 }
  0x4a   : > { %577 = vmatprep.subr.bf16.mxu1 %v705_v0 }
  0x4d   : > { %578 = vmatpush3.bf16.msra.mxu1 %v635_v14 }
 0x100   : > { %v303_v16 = vpop.f32.mrf.mxu0 }
 0x101   : > { %vm311_vm3 = vcmp.gt.f32.partialorder %v303_v16, 0.0  ;;  %v313_v17 = vmul.f32 2.5, %v303_v16 }
 0x102   : > { %vm312_vm4 = vmand %vm310_vm2, %vm311_vm3  ;;  %v561_v18 = vpop.f32.mrf.mxu0 }
 0x103   : > { %vm532_vm5 = vmpackc.low %vm312_vm4, %vm312_vm4  ;;  %v533_v19 = vpack.c.bf16 %v313_v17, %v313_v17 }
 0x104   : > { %v306_v20 = vpop.f32.mrf.mxu0 }
 0x105   : > { %580 = vmatmul.mubr.msk.bf16.vlgmr.msra.gmra.mxu1 %vm532_vm5, %v533_v19 }
 0x106   : > { %v562_v21 = vpop.f32.mrf.mxu0 }
 0x1c5   : > { %v414_v22 = vpop.f32.mrf.mxu1 }
 0x1c6   : > { %v421_v23 = vsel %vm420_vm6, %v414_v22, -inf }
 0x1c7   : > { %422 = vmax.xlane.f32.xlu0 %v421_v23  ;;  %v581_v24 = vpop.f32.mrf.mxu1 }
 0x1c9   : > { %v417_v25 = vpop.f32.mrf.mxu1 }
 0x1cb   : > { %v582_v26 = vpop.f32.mrf.mxu1 }
 0x250   : > { %v423_v27 = vpop.xlane.xlu0 %422 }
 0x251   : > { %v424_v28 = vsub.f32 %v414_v22, %v423_v27 }
 0x253   : > { %v425_v29 = vmul.f32 1.442695, %v424_v28 }
 0x255   : > { %636 = vpow2.f32 %v425_v29 }
 0x262   : > { %v637_v30 = vpop.eup %636 }
 0x263   : > { %v427_v31 = vsel %vm420_vm6, %v637_v30, 0.0 }
 0x264   : > { %428 = vadd.xlane.f32.xlu0 %v427_v31 }
 0x2ed   : > { %v429_v32 = vpop.xlane.xlu0 %428 }
 0x2ee   : > { %638 = vrcp.f32 %v429_v32 }
 0x2fb   : > { %v639_v33 = vpop.eup %638 }
 0x2fc   : > { %v431_v34 = vmul.f32 %v639_v33, %v637_v30 }
 0x2fe   : > { %432 = vst.msk [vmem:[%s229_s12] sm:$0xff] %vm420_vm6, %v431_v34 }
 0x2ff PF: > { %p14_p9 = scmp.ge.s32.totalorder %s754_s20, 6   ;;  %s897_s15 = smov %s694_s16 }
 0x300   : > { %s898_s16 = smov %s698_s17  ;;  %s899_s17 = smov %s764_s23 }
 0x301   : > { %s900_s18 = smov %s754_s20  ;;  %16 = sbr.rel (!%p14_p9) target bundleno = 3 (0x3), region = 79 }
 0x306   :  { %452 = vsyncpa [#allocation3], 1 }
 0x307   :  { %454 = vsyncpa [#allocation3 + $0x1], 1 }

</bundles_post_ra>
